<compile_context>
chip_gen: v5e
topology: v5e:2x2
jax: 0.10.0
libtpu: 0.0.40
codegen_flags: <defaults>
</compile_context>

<pallas_src>
import jax
import jax.numpy as jnp
from jax.experimental import pallas as pl
from jax.experimental.pallas import tpu as pltpu

_LANE = 128
_MAX_COLS = 1024          # lane-dense slab width (multiple of 128)
_TILE_BYTES = 1 << 20     # ~1 MiB per tile buffer


def _copy_kernel(x_ref, o_ref):
    # Identity elementwise copy of the current tile.
    o_ref[...] = x_ref[...]


def _pallas_copy_2d(x2d: jax.Array) -> jax.Array:
    """Tiled, pipelined identity copy of a 2D (rows, cols) slab (cols % 128 == 0)."""
    rows, cols = x2d.shape
    itemsize = jnp.dtype(x2d.dtype).itemsize
    # Rows per tile: ~_TILE_BYTES per buffer, rounded down to a multiple of 8
    # (sublane granularity). With default 2-deep buffering on input and output
    # this keeps total VMEM use to a few MiB on every TPU generation.
    tile_r = max(8, (_TILE_BYTES // (cols * itemsize)) // 8 * 8)
    if tile_r >= rows:
        tile_r = rows  # small array: single full block (still legal)
    grid = (pl.cdiv(rows, tile_r),)
    return pl.pallas_call(
        _copy_kernel,
        out_shape=jax.ShapeDtypeStruct((rows, cols), x2d.dtype),
        grid_spec=pltpu.PrefetchScalarGridSpec(
            num_scalar_prefetch=0,
            grid=grid,
            in_specs=[pl.BlockSpec((tile_r, cols), lambda i: (i, 0))],
            out_specs=pl.BlockSpec((tile_r, cols), lambda i: (i, 0)),
        ),
        compiler_params=pltpu.CompilerParams(
            dimension_semantics=("parallel",),  # independent tiles; lets v7x
        ),                                      # shard the grid across 2 TCs
    )(x2d)


def _pallas_identity_copy_flat(x: jax.Array) -> jax.Array:
    """Row-major flatten x and copy it through the tiled Pallas kernel."""
    total = x.size
    flat = jnp.reshape(x, (total,))
    if total == 0:
        return flat
    # Pick the widest lane-dense column count (multiple of 128, capped at
    # _MAX_COLS) that divides the element count.
    cols = None
    for c in (_MAX_COLS, 512, 256, _LANE):
        if total % c == 0:
            cols = c
            break
    if cols is None:
        # Pad to a sublane/lane-dense multiple of 8*128 so the copy stays
        # fully dense and tiled, then strip the padding afterwards.
        cols = _LANE
        chunk = 8 * cols
        padded = ((total + chunk - 1) // chunk) * chunk
        flat = jnp.pad(flat, (0, padded - total))
    y2d = _pallas_copy_2d(jnp.reshape(flat, (-1, cols)))
    return jnp.reshape(y2d, (-1,))[:total]


class Reshape:
    """JAX/Pallas equivalent of the PyTorch Reshape module."""

    def __init__(self, dim: tuple) -> None:
        self.dim = tuple(dim)

    def __call__(self, x: jax.Array) -> jax.Array:
        y_flat = _pallas_identity_copy_flat(x)
        # Row-major reshape == torch.reshape on contiguous input.
        return jnp.reshape(y_flat, self.dim)


if __name__ == "__main__":
    key = jax.random.PRNGKey(0)
    # Small NCHW input consistent with a GAN feature map.
    x = jax.random.normal(key, (2, 4, 16, 16), dtype=jnp.float32)

    # Reshape (2, 4, 16, 16) -> (2, 1024), as a Tensorflow-style Reshape would.
    layer = Reshape(dim=(2, 1024))
    y = layer(x)
    y = jax.block_until_ready(y)

    # Verify against plain JAX reshape (same semantics as torch.reshape).
    ref = jnp.reshape(x, (2, 1024))
    assert y.shape == (2, 1024), y.shape
    assert y.dtype == x.dtype
    assert bool(jnp.all(y == ref))

    # Also exercise a non-128-divisible size to hit the padding path.
    x2 = jax.random.normal(jax.random.PRNGKey(1), (3, 5, 7), dtype=jnp.float32)
    y2 = jax.block_until_ready(Reshape(dim=(105,))(x2))
    assert bool(jnp.all(y2 == jnp.reshape(x2, (105,))))

    print("KERNEL_OK")
</pallas_src>

<mosaic_0001>
module attributes {stable_mosaic.version = 11 : i64} {
  func.func @_copy_kernel(%arg0: i32, %arg1: memref<2x1024xf32, #tpu.memory_space<vmem>>, %arg2: memref<2x1024xf32, #tpu.memory_space<vmem>>) attributes {dimension_semantics = [#tpu.dimension_semantics<parallel>], iteration_bounds = array<i64: 1>, scalar_prefetch = 0 : i64, scratch_operands = 0 : i64, tpu.core_type = #tpu.core_type<tc>, window_params = [{transform_indices = @transform_0, window_bounds = array<i64: 2, 1024>}, {transform_indices = @transform_1, window_bounds = array<i64: 2, 1024>}]} {
    %c0 = arith.constant 0 : index
    %c0_0 = arith.constant 0 : index
    %0 = vector.load %arg1[%c0, %c0_0] : memref<2x1024xf32, #tpu.memory_space<vmem>>, vector<2x1024xf32>
    %c0_1 = arith.constant 0 : index
    %c0_2 = arith.constant 0 : index
    %1 = vector.load %arg2[%c0_1, %c0_2] : memref<2x1024xf32, #tpu.memory_space<vmem>>, vector<2x1024xf32>
    tpu.vector_store %arg2[%c0_1, %c0_2], %0 {strides = array<i32>} : memref<2x1024xf32, #tpu.memory_space<vmem>>, vector<2x1024xf32>,
    return
  }
  func.func @transform_0(%arg0: i32) -> (i32, i32) {
    %c0_i32 = arith.constant 0 : i32
    %c0_i32_0 = arith.constant 0 : i32
    return %arg0, %c0_i32 : i32, i32
  }
  func.func @transform_1(%arg0: i32) -> (i32, i32) {
    %c0_i32 = arith.constant 0 : i32
    %c0_i32_0 = arith.constant 0 : i32
    return %arg0, %c0_i32 : i32, i32
  }
}

</mosaic_0001>

<bundles_post_ra>
// kernel: tpu_custom_call.1
= control target key start
LH: loop header
LB: loop body
LE: loop exit
PB: predicated region body
PF: predicated region fallthrough
CT: control target
= control target key end

     0   :  { %6 = vsyncpa [#allocation3], 0  ;;  %s116_s0 = inlined_call_operand.hbm [shape: f32[2,1024], index: 0, kind: input, shape index: {}]   ;;  %s117_s1 = inlined_call_operand.hbm [shape: f32[2,1024], index: 1, kind: output, shape index: {}]  }
   0x1   :  { %7 = vsyncpa [#allocation4], 0  ;;  %s13_s8 = sshll.u32 %s116_s0, 4  ;;  %s98_s9 = smov [#allocation2]   ;;  %s14_s8 = int_to_ptr.hbm [resolvable:$true] %s13_s8 }
   0x2   :  { %s15_s10 = sshll.u32 %s98_s9, 4  ;;  %s16_s10 = int_to_ptr.vmem [resolvable:$true] %s15_s10 }
   0x3   :  { %18 = dma.hbm_to_vmem [thread:$0]  %s14_s8, 256, %s16_s10, [#allocation3]  }
   0x4   :  { %94 = dma.done.wait [#allocation3], 256  }
   0x5   :  { %95 = vsyncadd [#allocation3], 4294967040  ;;  %s99_s11 = smov [#allocation5]   ;;  %s34_s15 = sshll.u32 %s117_s1, 4  ;;  %v23_v0 = vld [vmem:[#allocation2] sm:$0xff]  ;;  %v24_v1 = vld [vmem:[#allocation2 + $0x8] sm:$0xff]  ;;  %s35_s15 = int_to_ptr.hbm [resolvable:$true] %s34_s15 }
   0x6   :  { %s32_s12 = sshll.u32 %s99_s11, 4  ;;  %25 = vst [vmem:[#allocation5] sm:$0xff] %v23_v0  ;;  %s33_s12 = int_to_ptr.vmem [resolvable:$true] %s32_s12 }
   0x7   :  { %26 = vst [vmem:[#allocation5 + $0x8] sm:$0xff] %v24_v1 }
   0x8   :  { %37 = dma.vmem_to_hbm [thread:$0]  %s33_s12, 256, %s35_s15, [#allocation4]  }
   0x9   :  { %96 = dma.done.wait [#allocation4], 256  }
   0xa   :  { %97 = vsyncadd [#allocation4], 4294967040 }
   0xb   :  { %42 = vsyncpa [#allocation3], 1 }
   0xc   :  { %43 = vsyncpa [#allocation4], 1 }

</bundles_post_ra>
